<compile_context>
chip_gen: v7x
topology: tpu7x:2x2x1
jax: 0.10.0
libtpu: 0.0.40
codegen_flags: <defaults>
</compile_context>

<pallas_src>
import functools

import jax
import jax.numpy as jnp
from jax.experimental import pallas as pl
from jax.experimental.pallas import tpu as pltpu


# ---------------------------------------------------------------------------
# Kernel
# ---------------------------------------------------------------------------
def _cross_attn_kernel(x_ref, y_ref, wq_ref, wkv_ref, bq_ref, bkv_ref, o_ref):
    Bb, Sq, D = x_ref.shape
    _, Sk, _ = y_ref.shape

    # Flatten the batch block into rows -> tall 2-D LHS tiles for the MXU.
    # Layout-free because Sq, Sk are multiples of 8 and D a multiple of 128
    # (asserted in the wrapper).
    x2 = x_ref[...].reshape(Bb * Sq, D)          # (Bb*Sq, D)
    y2 = y_ref[...].reshape(Bb * Sk, D)          # (Bb*Sk, D)

    # Query projection (attention scale already folded into wq/bq on the host).
    q = (jnp.dot(x2, wq_ref[...], preferred_element_type=jnp.float32)
         + bq_ref[...]).reshape(Bb, Sq, D)

    # Fused key/value projection: one (Bb*Sk, D) x (D, 2D) MXU pass.
    kv = (jnp.dot(y2, wkv_ref[...], preferred_element_type=jnp.float32)
          + bkv_ref[...])                        # (Bb*Sk, 2D)
    k = kv[:, :D].reshape(Bb, Sk, D)             # split at lane 128*n: free
    v = kv[:, D:].reshape(Bb, Sk, D)

    # Batched QK^T contracting last dims -> dot_general; no k.T materialized.
    s = jnp.einsum("bqd,bkd->bqk", q, k, preferred_element_type=jnp.float32)

    # Numerically-stable softmax along last axis (matches torch.softmax).
    # exp on EUP; denominator via EUP approximate reciprocal (idle slot).
    s = s - jnp.max(s, axis=-1, keepdims=True)
    p = jnp.exp(s)
    p = p * pl.reciprocal(jnp.sum(p, axis=-1, keepdims=True), approx=True)

    out = jnp.einsum("bqk,bkd->bqd", p.astype(v.dtype), v,
                     preferred_element_type=jnp.float32)
    o_ref[...] = out.astype(o_ref.dtype)


# ---------------------------------------------------------------------------
# Block / grid selection helpers
# ---------------------------------------------------------------------------
def _tensorcores_per_device():
    """Best-effort count of TensorCores addressable by one Pallas kernel."""
    try:
        dev = jax.devices()[0]
        n = getattr(dev, "num_cores", None)
        if isinstance(n, int) and n >= 1:
            return n
        kind = str(getattr(dev, "device_kind", "")).lower()
        # v7x / v4 / v5p expose 2 TensorCores behind one device (megacore).
        if any(tag in kind for tag in ("v7", "v4", "v5p")):
            return 2
    except Exception:
        pass
    return 1


def _vmem_bytes_estimate(Bb, Sq, Sk, D, itemsize=4):
    """Rough per-grid-step VMEM footprint (double-buffered IO + f32 temps)."""
    io_elems = (Bb * Sq * D            # x block
                + Bb * Sk * D          # y block
                + D * D + D * 2 * D    # Wq, Wkv
                + 3 * D                # biases
                + Bb * Sq * D)         # out block
    sk_pad = max(Sk, 128)              # lane padding of the score tensor
    temps = (Bb * Sq * D               # q (f32)
             + Bb * Sk * 2 * D         # kv (f32)
             + 2 * Bb * Sq * sk_pad    # s, p (f32)
             + Bb * Sq * D)            # out accumulator (f32)
    return 2 * io_elems * itemsize + temps * 4


def _pick_block_b(B, Sq, Sk, D, n_cores, vmem_budget=24 * 2**20):
    """Largest batch block that fits the VMEM budget; grid collapses to a
    single step on 1-TC chips and to an even (core-balanced) step count on
    multi-TC chips."""
    divisors = [d for d in range(1, B + 1) if B % d == 0]
    feasible = [d for d in divisors
                if _vmem_bytes_estimate(d, Sq, Sk, D) <= vmem_budget]
    if not feasible:
        return 1  # TODO(synk): needs Sq tiling / flash Sk loop to shrink further
    if n_cores <= 1:
        return max(feasible)                      # grid=(1,) when possible
    balanced = [d for d in feasible
                if (B // d) >= n_cores and (B // d) % n_cores == 0]
    return max(balanced) if balanced else max(feasible)


# ---------------------------------------------------------------------------
# Host-side parameter prep (hoist out of the per-call path)
# ---------------------------------------------------------------------------
def prepare_cross_attention_params(wq, bq, wk, bk, wv, bv):
    """Fold the 1/sqrt(D) scale into Wq/bq and fuse K/V weights & biases.
    Call once at parameter-load time; exact rewrite of the PyTorch math."""
    D = wq.shape[0]
    scale = float(D) ** (-0.5)
    wq_s = (wq * scale).astype(wq.dtype)                    # (D, D)
    bq_s = (bq * scale).reshape(1, D).astype(bq.dtype)      # (1, D)
    wkv = jnp.concatenate([wk, wv], axis=1)                 # (D, 2D)
    bkv = jnp.concatenate([bk, bv]).reshape(1, 2 * D)       # (1, 2D)
    return wq_s, bq_s, wkv, bkv


# ---------------------------------------------------------------------------
# Wrapper
# ---------------------------------------------------------------------------
def cross_attention_prepared(x, y, wq_s, bq_s, wkv, bkv, *, block_b=None):
    """x: (B, Sq, D), y: (B, Sk, D); params from prepare_cross_attention_params."""
    B, Sq, D = x.shape
    By, Sk, Dy = y.shape
    assert By == B and Dy == D
    # Hard preconditions so the in-kernel reshapes / kv split never relayout.
    assert Sq % 8 == 0 and Sk % 8 == 0, "Sq and Sk must be multiples of 8"
    assert D % 128 == 0, "dim must be a multiple of 128"

    n_cores = _tensorcores_per_device()
    Bb = block_b if block_b is not None else _pick_block_b(B, Sq, Sk, D, n_cores)
    assert B % Bb == 0, "batch block must divide batch"
    n_steps = B // Bb

    itemsize = jnp.dtype(x.dtype).itemsize
    cost = pl.CostEstimate(
        flops=(2 * B * Sq * D * D            # q projection
               + 2 * B * Sk * D * 2 * D      # fused kv projection
               + 2 * B * Sq * Sk * D         # QK^T
               + 2 * B * Sq * Sk * D),       # P @ V
        transcendentals=B * Sq * Sk,         # exp in softmax
        bytes_accessed=itemsize * (B * Sq * D + B * Sk * D + B * Sq * D
                                   + D * D + D * 2 * D + 3 * D),
    )

    return pl.pallas_call(
        _cross_attn_kernel,
        out_shape=jax.ShapeDtypeStruct((B, Sq, D), x.dtype),
        grid_spec=pltpu.PrefetchScalarGridSpec(
            num_scalar_prefetch=0,
            grid=(n_steps,),
            in_specs=[
                pl.BlockSpec((Bb, Sq, D), lambda b: (b, 0, 0)),   # x
                pl.BlockSpec((Bb, Sk, D), lambda b: (b, 0, 0)),   # y
                pl.BlockSpec((D, D), lambda b: (0, 0)),           # Wq (pre-scaled)
                pl.BlockSpec((D, 2 * D), lambda b: (0, 0)),       # [Wk | Wv]
                pl.BlockSpec((1, D), lambda b: (0, 0)),           # bq (pre-scaled)
                pl.BlockSpec((1, 2 * D), lambda b: (0, 0)),       # [bk | bv]
            ],
            out_specs=pl.BlockSpec((Bb, Sq, D), lambda b: (b, 0, 0)),
        ),
        compiler_params=pltpu.CompilerParams(
            dimension_semantics=("parallel",),
            vmem_limit_bytes=32 * 1024 * 1024,
        ),
        cost_estimate=cost,
    )(x, y, wq_s, wkv, bq_s, bkv)


def cross_attention(x, y, wq, bq, wk, bk, wv, bv, *, block_b=None):
    """Convenience wrapper matching the PyTorch forward (prep done inline)."""
    params = prepare_cross_attention_params(wq, bq, wk, bk, wv, bv)
    return cross_attention_prepared(x, y, *params, block_b=block_b)


def cross_attention_ref(x, y, wq, bq, wk, bk, wv, bv):
    """Pure-JAX reference mirroring the PyTorch forward."""
    D = x.shape[-1]
    q = x @ wq + bq
    k = y @ wk + bk
    v = y @ wv + bv
    s = jnp.einsum("bqd,bkd->bqk", q, k) * (D ** -0.5)
    p = jax.nn.softmax(s, axis=-1)
    return jnp.einsum("bqk,bkd->bqd", p, v)


if __name__ == "__main__":
    # D = 128 keeps every tile (8,128)-aligned and the output store lane-dense.
    B, Sq, Sk, D = 4, 8, 8, 128
    key = jax.random.PRNGKey(0)
    kx, ky, k1, k2, k3, k4, k5, k6 = jax.random.split(key, 8)

    x = jax.random.normal(kx, (B, Sq, D), dtype=jnp.float32)
    y = jax.random.normal(ky, (B, Sk, D), dtype=jnp.float32)

    # Deterministic parameter init (shapes from nn.Linear(dim, dim)),
    # stored already transposed so projection is `x @ W + b`.
    bound = 1.0 / (D ** 0.5)
    wq = jax.random.uniform(k1, (D, D), jnp.float32, -bound, bound)
    wk = jax.random.uniform(k2, (D, D), jnp.float32, -bound, bound)
    wv = jax.random.uniform(k3, (D, D), jnp.float32, -bound, bound)
    bq = jax.random.uniform(k4, (D,), jnp.float32, -bound, bound)
    bk = jax.random.uniform(k5, (D,), jnp.float32, -bound, bound)
    bv = jax.random.uniform(k6, (D,), jnp.float32, -bound, bound)

    # Hoisted, one-time weight prep (not re-done per forward call).
    prepared = prepare_cross_attention_params(wq, bq, wk, bk, wv, bv)
    prepared = jax.tree_util.tree_map(jax.block_until_ready, prepared)

    fwd = jax.jit(functools.partial(cross_attention_prepared))
    out = fwd(x, y, *prepared)
    out = jax.block_until_ready(out)

    ref = cross_attention_ref(x, y, wq, bq, wk, bk, wv, bv)
    assert out.shape == (B, Sq, D)
    # approx=True EUP reciprocal in the softmax loosens tolerance slightly.
    assert jnp.allclose(out, ref, atol=2e-3, rtol=2e-3), "mismatch vs reference"

    print("KERNEL_OK")
</pallas_src>

<mosaic_0001>
module attributes {stable_mosaic.version = 11 : i64} {
  func.func @_cross_attn_kernel(%arg0: i32, %arg1: memref<4x8x128xf32, #tpu.memory_space<vmem>>, %arg2: memref<4x8x128xf32, #tpu.memory_space<vmem>>, %arg3: memref<128x128xf32, #tpu.memory_space<vmem>>, %arg4: memref<128x256xf32, #tpu.memory_space<vmem>>, %arg5: memref<1x128xf32, #tpu.memory_space<vmem>>, %arg6: memref<1x256xf32, #tpu.memory_space<vmem>>, %arg7: memref<4x8x128xf32, #tpu.memory_space<vmem>>) attributes {dimension_semantics = [#tpu.dimension_semantics<parallel>], iteration_bounds = array<i64: 1>, scalar_prefetch = 0 : i64, scratch_operands = 0 : i64, tpu.core_type = #tpu.core_type<tc>, window_params = [{transform_indices = @transform_0, window_bounds = array<i64: 4, 8, 128>}, {transform_indices = @transform_1, window_bounds = array<i64: 4, 8, 128>}, {pipeline_mode = #tpu.pipeline_mode<synchronous>, transform_indices = @transform_2, window_bounds = array<i64: 128, 128>}, {pipeline_mode = #tpu.pipeline_mode<synchronous>, transform_indices = @transform_3, window_bounds = array<i64: 128, 256>}, {pipeline_mode = #tpu.pipeline_mode<synchronous>, transform_indices = @transform_4, window_bounds = array<i64: 1, 128>}, {pipeline_mode = #tpu.pipeline_mode<synchronous>, transform_indices = @transform_5, window_bounds = array<i64: 1, 256>}, {transform_indices = @transform_6, window_bounds = array<i64: 4, 8, 128>}]} {
    %c0 = arith.constant 0 : index
    %c0_0 = arith.constant 0 : index
    %c0_1 = arith.constant 0 : index
    %0 = vector.load %arg1[%c0, %c0_0, %c0_1] : memref<4x8x128xf32, #tpu.memory_space<vmem>>, vector<4x8x128xf32>
    %1 = vector.shape_cast %0 : vector<4x8x128xf32> to vector<32x128xf32>
    %c0_2 = arith.constant 0 : index
    %c0_3 = arith.constant 0 : index
    %c0_4 = arith.constant 0 : index
    %2 = vector.load %arg2[%c0_2, %c0_3, %c0_4] : memref<4x8x128xf32, #tpu.memory_space<vmem>>, vector<4x8x128xf32>
    %3 = vector.shape_cast %2 : vector<4x8x128xf32> to vector<32x128xf32>
    %c0_5 = arith.constant 0 : index
    %c0_6 = arith.constant 0 : index
    %4 = vector.load %arg3[%c0_5, %c0_6] : memref<128x128xf32, #tpu.memory_space<vmem>>, vector<128x128xf32>
    %cst = arith.constant dense<0.000000e+00> : vector<32x128xf32>
    %5 = tpu.matmul %1, %4, %cst {dimension_numbers = #tpu.dot_dimension_numbers<[1], [0], [0], [1], [0, 0, 1, 1], [], []>} : vector<32x128xf32>, vector<128x128xf32>, vector<32x128xf32> -> vector<32x128xf32>
    %c0_7 = arith.constant 0 : index
    %c0_8 = arith.constant 0 : index
    %6 = vector.load %arg5[%c0_7, %c0_8] : memref<1x128xf32, #tpu.memory_space<vmem>>, vector<1x128xf32>
    %7 = vector.broadcast %6 : vector<1x128xf32> to vector<32x128xf32>
    %8 = arith.addf %5, %7 : vector<32x128xf32>
    %9 = vector.shape_cast %8 : vector<32x128xf32> to vector<4x8x128xf32>
    %c0_9 = arith.constant 0 : index
    %c0_10 = arith.constant 0 : index
    %10 = vector.load %arg4[%c0_9, %c0_10] : memref<128x256xf32, #tpu.memory_space<vmem>>, vector<128x256xf32>
    %cst_11 = arith.constant dense<0.000000e+00> : vector<32x256xf32>
    %11 = tpu.matmul %3, %10, %cst_11 {dimension_numbers = #tpu.dot_dimension_numbers<[1], [0], [0], [1], [0, 0, 1, 1], [], []>} : vector<32x128xf32>, vector<128x256xf32>, vector<32x256xf32> -> vector<32x256xf32>
    %c0_12 = arith.constant 0 : index
    %c0_13 = arith.constant 0 : index
    %12 = vector.load %arg6[%c0_12, %c0_13] : memref<1x256xf32, #tpu.memory_space<vmem>>, vector<1x256xf32>
    %13 = vector.broadcast %12 : vector<1x256xf32> to vector<32x256xf32>
    %14 = arith.addf %11, %13 : vector<32x256xf32>
    %15 = vector.extract_strided_slice %14 {offsets = [0, 0], sizes = [32, 128], strides = [1, 1]} : vector<32x256xf32> to vector<32x128xf32>
    %16 = vector.shape_cast %15 : vector<32x128xf32> to vector<4x8x128xf32>
    %17 = vector.extract_strided_slice %14 {offsets = [0, 128], sizes = [32, 128], strides = [1, 1]} : vector<32x256xf32> to vector<32x128xf32>
    %18 = vector.shape_cast %17 : vector<32x128xf32> to vector<4x8x128xf32>
    "tpu.trace_start"() <{level = 10 : i32, message = "bqd,bkd->bqk"}> : () -> ()
    %cst_14 = arith.constant dense<0.000000e+00> : vector<4x8x8xf32>
    %19 = tpu.matmul %9, %16, %cst_14 {dimension_numbers = #tpu.dot_dimension_numbers<[2], [2], [1], [1], [0, 0, 0, 1, 1, 1], [0], [0]>} : vector<4x8x128xf32>, vector<4x8x128xf32>, vector<4x8x8xf32> -> vector<4x8x8xf32>
    "tpu.trace_stop"() : () -> ()
    %cst_15 = arith.constant dense<0xFF800000> : vector<4x8xf32>
    %20 = vector.multi_reduction <maximumf>, %19, %cst_15 [2] : vector<4x8x8xf32> to vector<4x8xf32>
    %21 = vector.shape_cast %20 : vector<4x8xf32> to vector<4x8x1xf32>
    %22 = vector.broadcast %21 : vector<4x8x1xf32> to vector<4x8x8xf32>
    %23 = arith.subf %19, %22 : vector<4x8x8xf32>
    %24 = math.exp %23 : vector<4x8x8xf32>
    %cst_16 = arith.constant dense<0.000000e+00> : vector<4x8xf32>
    %25 = vector.multi_reduction <add>, %24, %cst_16 [2] : vector<4x8x8xf32> to vector<4x8xf32>
    %26 = vector.shape_cast %25 : vector<4x8xf32> to vector<4x8x1xf32>
    %27 = tpu.reciprocal %26 {approx = true} : vector<4x8x1xf32> -> vector<4x8x1xf32>
    %28 = vector.broadcast %27 : vector<4x8x1xf32> to vector<4x8x8xf32>
    %29 = arith.mulf %24, %28 : vector<4x8x8xf32>
    "tpu.trace_start"() <{level = 10 : i32, message = "bqk,bkd->bqd"}> : () -> ()
    %cst_17 = arith.constant dense<0.000000e+00> : vector<4x8x128xf32>
    %30 = tpu.matmul %29, %18, %cst_17 {dimension_numbers = #tpu.dot_dimension_numbers<[2], [1], [1], [2], [0, 0, 0, 1, 1, 2], [0], [0]>} : vector<4x8x8xf32>, vector<4x8x128xf32>, vector<4x8x128xf32> -> vector<4x8x128xf32>
    "tpu.trace_stop"() : () -> ()
    %c0_18 = arith.constant 0 : index
    %c0_19 = arith.constant 0 : index
    %c0_20 = arith.constant 0 : index
    %31 = vector.load %arg7[%c0_18, %c0_19, %c0_20] : memref<4x8x128xf32, #tpu.memory_space<vmem>>, vector<4x8x128xf32>
    tpu.vector_store %arg7[%c0_18, %c0_19, %c0_20], %30 {strides = array<i32>} : memref<4x8x128xf32, #tpu.memory_space<vmem>>, vector<4x8x128xf32>,
    return
  }
  func.func @transform_0(%arg0: i32) -> (i32, i32, i32) {
    %c0_i32 = arith.constant 0 : i32
    %c0_i32_0 = arith.constant 0 : i32
    %c0_i32_1 = arith.constant 0 : i32
    return %arg0, %c0_i32, %c0_i32_0 : i32, i32, i32
  }
  func.func @transform_1(%arg0: i32) -> (i32, i32, i32) {
    %c0_i32 = arith.constant 0 : i32
    %c0_i32_0 = arith.constant 0 : i32
    %c0_i32_1 = arith.constant 0 : i32
    return %arg0, %c0_i32, %c0_i32_0 : i32, i32, i32
  }
  func.func @transform_2(%arg0: i32) -> (i32, i32) {
    %c0_i32 = arith.constant 0 : i32
    %c0_i32_0 = arith.constant 0 : i32
    %c0_i32_1 = arith.constant 0 : i32
    return %c0_i32, %c0_i32_0 : i32, i32
  }
  func.func @transform_3(%arg0: i32) -> (i32, i32) {
    %c0_i32 = arith.constant 0 : i32
    %c0_i32_0 = arith.constant 0 : i32
    %c0_i32_1 = arith.constant 0 : i32
    return %c0_i32, %c0_i32_0 : i32, i32
  }
  func.func @transform_4(%arg0: i32) -> (i32, i32) {
    %c0_i32 = arith.constant 0 : i32
    %c0_i32_0 = arith.constant 0 : i32
    %c0_i32_1 = arith.constant 0 : i32
    return %c0_i32, %c0_i32_0 : i32, i32
  }
  func.func @transform_5(%arg0: i32) -> (i32, i32) {
    %c0_i32 = arith.constant 0 : i32
    %c0_i32_0 = arith.constant 0 : i32
    %c0_i32_1 = arith.constant 0 : i32
    return %c0_i32, %c0_i32_0 : i32, i32
  }
  func.func @transform_6(%arg0: i32) -> (i32, i32, i32) {
    %c0_i32 = arith.constant 0 : i32
    %c0_i32_0 = arith.constant 0 : i32
    %c0_i32_1 = arith.constant 0 : i32
    return %arg0, %c0_i32, %c0_i32_0 : i32, i32, i32
  }
}

</mosaic_0001>

<bundles_post_ra>
// kernel: cross_attention_prepared.1
= control target key start
LH: loop header
LB: loop body
LE: loop exit
PB: predicated region body
PF: predicated region fallthrough
CT: control target
= control target key end

     0   :  { %11 = vsyncpa [#allocation3], 0  ;;  %s1480_s0 = inlined_call_operand.hbm [shape: f32[4,8,128], index: 0, kind: input, shape index: {}]   ;;  %s1481_s1 = inlined_call_operand.hbm [shape: f32[4,8,128], index: 1, kind: input, shape index: {}]   ;;  %s1482_s2 = inlined_call_operand.hbm [shape: f32[128,128], index: 2, kind: input, shape index: {}]   ;;  %s1483_s3 = inlined_call_operand.hbm [shape: f32[128,256], index: 3, kind: input, shape index: {}]   ;;  %s1484_s4 = inlined_call_operand.vmem [shape: f32[1,128], index: 4, kind: input, shape index: {}]   ;;  %s1485_s5 = inlined_call_operand.vmem [shape: f32[1,256], index: 5, kind: input, shape index: {}]   ;;  %s1486_s6 = inlined_call_operand.hbm [shape: f32[4,8,128], index: 6, kind: output, shape index: {}]  }
   0x1   :  { %12 = vsyncpa [#allocation6], 0 }
   0x2   :  { %13 = vsyncpa [#allocation9], 0 }
   0x3   :  { %14 = vsyncpa [#allocation4], 0  ;;  %s1296_s21 = smov [#allocation5]   ;;  %s1297_s23 = smov [#allocation2]  }
   0x4   :  { %s32_s22 = sshll.u32 %s1296_s21, 4  ;;  %s20_s24 = sshll.u32 %s1297_s23, 4  ;;  %s33_s22 = int_to_ptr.vmem [resolvable:$true] %s32_s22  ;;  %s1342_s24 = int_to_ptr.vmem [resolvable:$true] %s20_s24 }
   0x5   :  { %s1178_s27 = scalar_lea.hbm %s1481_s1, 512 }
   0x6   :  { %p1179_p0 = scmp.ne.s32.totalorder %s1481_s1, %s1178_s27  ;;  %p1182_p1 = scmp.lt.u32.totalorder %s1178_s27, %s1481_s1 }
   0x8   :  { %p1184_p2 = pnand %p1182_p1, %p1179_p0 }
   0xa   :  { %1187 = shalt.err (!%p1184_p2)
}
   0xb   :  { %s1188_s8 = scalar_lea.vmem %s33_s22, 512  ;;  %p1193_p4 = scmp.lt.s32.totalorder %s33_s22, %s33_s22 }
   0xc   :  { %p1189_p3 = scmp.ne.s32.totalorder %s33_s22, %s1188_s8  ;;  %p1194_p5 = scmp.lt.s32.totalorder %s1188_s8, %s1188_s8 }
   0xe   :  { %p1195_p6 = por %p1194_p5, %p1193_p4 }
  0x10   :  { %p1196_p7 = pnand %p1195_p6, %p1189_p3 }
  0x12   :  { %1199 = shalt.err (!%p1196_p7)
}
  0x13   :  { %s1298_s9 = smov 128   ;;  %s1299_s10 = smov 8  }
  0x14   :  { %38 = dma.hbm_to_vmem [thread:$0]  %s1481_s1, 512, %s33_s22, [#allocation6], %s1298_s9, %s1298_s9, %s1299_s10  }
  0x15   :  { %s1200_s15 = scalar_lea.hbm %s1480_s0, 512 }
  0x16   :  { %p1201_p8 = scmp.ne.s32.totalorder %s1480_s0, %s1200_s15  ;;  %p1204_p9 = scmp.lt.u32.totalorder %s1200_s15, %s1480_s0 }
  0x18   :  { %p1206_p10 = pnand %p1204_p9, %p1201_p8 }
  0x1a   :  { %1209 = shalt.err (!%p1206_p10)
}
  0x1b   :  { %s1210_s20 = scalar_lea.vmem %s1342_s24, 512  ;;  %p1215_p12 = scmp.lt.s32.totalorder %s1342_s24, %s1342_s24 }
  0x1c   :  { %p1211_p11 = scmp.ne.s32.totalorder %s1342_s24, %s1210_s20  ;;  %p1216_p13 = scmp.lt.s32.totalorder %s1210_s20, %s1210_s20 }
  0x1e   :  { %p1217_p0 = por %p1216_p13, %p1215_p12 }
  0x20   :  { %p1218_p1 = pnand %p1217_p0, %p1211_p11 }
  0x22   :  { %1221 = shalt.err (!%p1218_p1)
}
  0x23   :  { %26 = dma.hbm_to_vmem [thread:$0]  %s1480_s0, 512, %s1342_s24, [#allocation3], %s1298_s9, %s1298_s9, %s1299_s10  }
  0x24   :  { %s1300_s22 = smov [#allocation7]   ;;  %s1301_s25 = smov [#allocation8]  }
  0x25   :  { %s44_s23 = sshll.u32 %s1300_s22, 4  ;;  %s56_s26 = sshll.u32 %s1301_s25, 4  ;;  %s45_s23 = int_to_ptr.vmem [resolvable:$true] %s44_s23  ;;  %s1379_s26 = int_to_ptr.vmem [resolvable:$true] %s56_s26 }
  0x26   :  { %s1222_s29 = scalar_lea.hbm %s1482_s2, 2048 }
  0x27   :  { %p1223_p2 = scmp.ne.s32.totalorder %s1482_s2, %s1222_s29  ;;  %p1226_p3 = scmp.lt.u32.totalorder %s1222_s29, %s1482_s2 }
  0x29   :  { %p1228_p4 = pnand %p1226_p3, %p1223_p2 }
  0x2b   :  { %1231 = shalt.err (!%p1228_p4)
}
  0x2c   :  { %s1232_s0 = scalar_lea.vmem %s45_s23, 2048  ;;  %p1237_p6 = scmp.lt.s32.totalorder %s45_s23, %s45_s23 }
  0x2d   :  { %p1233_p5 = scmp.ne.s32.totalorder %s45_s23, %s1232_s0  ;;  %p1238_p7 = scmp.lt.s32.totalorder %s1232_s0, %s1232_s0 }
  0x2f   :  { %p1239_p8 = por %p1238_p7, %p1237_p6 }
  0x31   :  { %p1240_p9 = pnand %p1239_p8, %p1233_p5 }
  0x33   :  { %1243 = shalt.err (!%p1240_p9)
}
  0x34   :  { %50 = dma.hbm_to_vmem [thread:$0]  %s1482_s2, 2048, %s45_s23, [#allocation6], %s1298_s9, %s1298_s9, %s1299_s10  }
  0x35   :  { %s1244_s15 = scalar_lea.hbm %s1483_s3, 4096 }
  0x36   :  { %p1245_p10 = scmp.ne.s32.totalorder %s1483_s3, %s1244_s15  ;;  %p1248_p11 = scmp.lt.u32.totalorder %s1244_s15, %s1483_s3 }
  0x38   :  { %p1250_p12 = pnand %p1248_p11, %p1245_p10 }
  0x3a   :  { %1253 = shalt.err (!%p1250_p12)
}
  0x3b   :  { %s1254_s20 = scalar_lea.vmem %s1379_s26, 4096  ;;  %p1259_p0 = scmp.lt.s32.totalorder %s1379_s26, %s1379_s26 }
  0x3c   :  { %p1255_p13 = scmp.ne.s32.totalorder %s1379_s26, %s1254_s20  ;;  %p1260_p1 = scmp.lt.s32.totalorder %s1254_s20, %s1254_s20 }
  0x3e   :  { %p1261_p2 = por %p1260_p1, %p1259_p0 }
  0x40   :  { %p1262_p3 = pnand %p1261_p2, %p1255_p13 }
  0x42   :  { %1265 = shalt.err (!%p1262_p3)
}
  0x43   :  { %s1302_s2 = smov 256   ;;  %s1303_s1 = smov 16  }
  0x44   :  { %62 = dma.hbm_to_vmem [thread:$0]  %s1483_s3, 4096, %s1379_s26, [#allocation9], %s1302_s2, %s1302_s2, %s1303_s1  }
  0x45   :  { %1288 = dma.done.wait [#allocation3], 512  }
  0x46   :  { %1289 = vsyncadd [#allocation3], 4294966784 }
  0x47   :  { %1290 = dma.done.wait [#allocation6], 2560  }
  0x48   :  { %1291 = vsyncadd [#allocation6], 4294964736 }
  0x49   :  { %1292 = dma.done.wait [#allocation9], 4096  }
  0x4a   :  { %1293 = vsyncadd [#allocation9], 4294963200  ;;  %v1304_v0 = vmov 0.0   ;;  %v196_v1 = vld [vmem:[#allocation8 + $0x8] sm:$0xff]  ;;  %v198_v2 = vld [vmem:[#allocation8 + $0x18] sm:$0xff]  ;;  %vm1305_vm0 = vmmov 0  }
  0x4b   :  { %303 = vmatprep.mubr.f32.mxu1 %v1304_v0  ;;  %v195_v3 = vld [vmem:[#allocation8] sm:$0xff]  ;;  %v1119_v4 = vpack.c.bf16 %v198_v2, %v196_v1  ;;  %v197_v5 = vld [vmem:[#allocation8 + $0x10] sm:$0xff]  ;;  %v88_v7 = vld [vmem:[#allocation7 + $0x8] sm:$0xff]  ;;  %vm608_vm1 = vcmask 64512  }
  0x4c   :  { %v87_v6 = vld [vmem:[#allocation7] sm:$0xff]  ;;  %v1121_v8 = vpack.c.bf16 %v197_v5, %v195_v3  ;;  %v200_v10 = vld [vmem:[#allocation8 + $0x28] sm:$0xff]  ;;  %v202_v11 = vld [vmem:[#allocation8 + $0x38] sm:$0xff] }
  0x4d   :  { %v1087_v9 = vpack.c.bf16 %v88_v7, %v87_v6  ;;  %v199_v12 = vld [vmem:[#allocation8 + $0x20] sm:$0xff]  ;;  %1120 = vmatprep.subr.bf16.mxu1 %v1119_v4  ;;  %v1123_v13 = vpack.c.bf16 %v202_v11, %v200_v10  ;;  %v201_v14 = vld [vmem:[#allocation8 + $0x30] sm:$0xff]  ;;  %v90_v16 = vld [vmem:[#allocation7 + $0x18] sm:$0xff] }
  0x4e   :  { %v89_v15 = vld [vmem:[#allocation7 + $0x10] sm:$0xff]  ;;  %1122 = vmatpush1.bf16.msra.mxu1 %v1121_v8  ;;  %v1125_v17 = vpack.c.bf16 %v201_v14, %v199_v12  ;;  %v204_v19 = vld [vmem:[#allocation8 + $0x48] sm:$0xff]  ;;  %v206_v20 = vld [vmem:[#allocation8 + $0x58] sm:$0xff] }
  0x4f   :  { %1088 = vmatprep.subr.bf16.mxu0 %v1087_v9  ;;  %v1091_v18 = vpack.c.bf16 %v90_v16, %v89_v15  ;;  %v203_v21 = vld [vmem:[#allocation8 + $0x40] sm:$0xff]  ;;  %1124 = vmatprep.subr.bf16.mxu1 %v1123_v13  ;;  %v1127_v22 = vpack.c.bf16 %v206_v20, %v204_v19  ;;  %v205_v23 = vld [vmem:[#allocation8 + $0x50] sm:$0xff]  ;;  %v92_v25 = vld [vmem:[#allocation7 + $0x28] sm:$0xff] }
  0x50   :  { %1090 = vmatpush3.bf16.msra.mxu0 %v1087_v9  ;;  %v91_v24 = vld [vmem:[#allocation7 + $0x20] sm:$0xff]  ;;  %v208_v27 = vld [vmem:[#allocation8 + $0x68] sm:$0xff]  ;;  %v210_v28 = vld [vmem:[#allocation8 + $0x78] sm:$0xff]  ;;  %v1129_v31 = vpack.c.bf16 %v205_v23, %v203_v21 }
  0x51   :  { %1092 = vmatprep.subr.bf16.mxu0 %v1091_v18  ;;  %v1095_v26 = vpack.c.bf16 %v92_v25, %v91_v24  ;;  %v93_v29 = vld [vmem:[#allocation7 + $0x30] sm:$0xff]  ;;  %v94_v30 = vld [vmem:[#allocation7 + $0x38] sm:$0xff]  ;;  %v1131_v32 = vpack.c.bf16 %v210_v28, %v208_v27  ;;  %v207_v33 = vld [vmem:[#allocation8 + $0x60] sm:$0xff] }
  0x52   :  { %1126 = vmatpush1.bf16.msra.mxu1 %v1125_v17  ;;  %v209_v34 = vld [vmem:[#allocation8 + $0x70] sm:$0xff]  ;;  %v1099_v35 = vpack.c.bf16 %v94_v30, %v93_v29  ;;  %v212_v36 = vld [vmem:[#allocation8 + $0x88] sm:$0xff]  ;;  %v214_v37 = vld [vmem:[#allocation8 + $0x98] sm:$0xff] }
  0x53   :  { %1128 = vmatprep.subr.bf16.mxu1 %v1127_v22  ;;  %v95_v38 = vld [vmem:[#allocation7 + $0x40] sm:$0xff]  ;;  %v96_v39 = vld [vmem:[#allocation7 + $0x48] sm:$0xff]  ;;  %v1133_v40 = vpack.c.bf16 %v209_v34, %v207_v33  ;;  %v1135_v41 = vpack.c.bf16 %v214_v37, %v212_v36  ;;  %v213_v43 = vld [vmem:[#allocation8 + $0x90] sm:$0xff] }
  0x54   :  { %1094 = vmatpush3.bf16.msra.mxu0 %v1091_v18  ;;  %v211_v42 = vld [vmem:[#allocation8 + $0x80] sm:$0xff]  ;;  %v1103_v44 = vpack.c.bf16 %v96_v39, %v95_v38  ;;  %v216_v45 = vld [vmem:[#allocation8 + $0xa8] sm:$0xff]  ;;  %v218_v46 = vld [vmem:[#allocation8 + $0xb8] sm:$0xff]  ;;  %v229_v18 = vlaneseq }
  0x55   :  { %1096 = vmatprep.subr.bf16.mxu0 %v1095_v26  ;;  %v97_v47 = vld [vmem:[#allocation7 + $0x50] sm:$0xff]  ;;  %v98_v48 = vld [vmem:[#allocation7 + $0x58] sm:$0xff]  ;;  %v1137_v49 = vpack.c.bf16 %v213_v43, %v211_v42  ;;  %v79_v50 = vld [vmem:[#allocation2] sm:$0xff]  ;;  %v1139_v51 = vpack.c.bf16 %v218_v46, %v216_v45 }
  0x56   :  { %1130 = vmatpush1.bf16.msra.mxu1 %v1129_v31  ;;  %v215_v52 = vld [vmem:[#allocation8 + $0xa0] sm:$0xff]  ;;  %v217_v53 = vld [vmem:[#allocation8 + $0xb0] sm:$0xff]  ;;  %v1107_v54 = vpack.c.bf16 %v98_v48, %v97_v47  ;;  %v220_v55 = vld [vmem:[#allocation8 + $0xc8] sm:$0xff]  ;;  %1041 = vmatprep.mubr.f32.mxu0 %v79_v50  ;;  %v230_v19 = vshrl.u32 %v229_v18, 7 }
  0x57   :  { %1132 = vmatprep.subr.bf16.mxu1 %v1131_v32  ;;  %v222_v56 = vld [vmem:[#allocation8 + $0xd8] sm:$0xff]  ;;  %v99_v57 = vld [vmem:[#allocation7 + $0x60] sm:$0xff]  ;;  %v100_v58 = vld [vmem:[#allocation7 + $0x68] sm:$0xff]  ;;  %v1141_v59 = vpack.c.bf16 %v217_v53, %v215_v52 }
  0x58   :  { %1098 = vmatpush3.bf16.msra.mxu0 %v1095_v26  ;;  %v1143_v60 = vpack.c.bf16 %v222_v56, %v220_v55  ;;  %v219_v61 = vld [vmem:[#allocation8 + $0xc0] sm:$0xff]  ;;  %v221_v62 = vld [vmem:[#allocation8 + $0xd0] sm:$0xff]  ;;  %v1111_v63 = vpack.c.bf16 %v100_v58, %v99_v57  ;;  %v224_v1 = vld [vmem:[#allocation8 + $0xe8] sm:$0xff]  ;;  %v231_v20 = vsub.s32 0, %v230_v19  ;;  %v235_v30 = vsub.s32 1, %v230_v19 }
  0x59   :  { %1100 = vmatprep.subr.bf16.mxu0 %v1099_v35  ;;  %v226_v2 = vld [vmem:[#allocation8 + $0xf8] sm:$0xff]  ;;  %v101_v3 = vld [vmem:[#allocation7 + $0x70] sm:$0xff]  ;;  %v1145_v5 = vpack.c.bf16 %v221_v62, %v219_v61  ;;  %v223_v7 = vld [vmem:[#allocation8 + $0xe0] sm:$0xff] }
  0x5a   :  { %1134 = vmatpush1.bf16.msra.mxu1 %v1133_v40  ;;  %v102_v4 = vld [vmem:[#allocation7 + $0x78] sm:$0xff]  ;;  %v1147_v6 = vpack.c.bf16 %v226_v2, %v224_v1  ;;  %v225_v8 = vld [vmem:[#allocation8 + $0xf0] sm:$0xff]  ;;  %v83_v11 = vld [vmem:[#allocation5] sm:$0xff] }
  0x5b   :  { %1136 = vmatprep.subr.bf16.mxu1 %v1135_v41  ;;  %v1115_v9 = vpack.c.bf16 %v102_v4, %v101_v3  ;;  %v1149_v10 = vpack.c.bf16 %v225_v8, %v223_v7  ;;  %v80_v12 = vld [vmem:[#allocation2 + $0x8] sm:$0xff]  ;;  %v81_v13 = vld [vmem:[#allocation2 + $0x10] sm:$0xff]  ;;  %v82_v15 = vld [vmem:[#allocation2 + $0x18] sm:$0xff] }
  0x5c   :  { %1102 = vmatpush3.bf16.msra.mxu0 %v1099_v35  ;;  %v84_v14 = vld [vmem:[#allocation5 + $0x8] sm:$0xff]  ;;  %v85_v16 = vld [vmem:[#allocation5 + $0x10] sm:$0xff]  ;;  %v86_v17 = vld [vmem:[#allocation5 + $0x18] sm:$0xff] }
  0x5d   :  { %1104 = vmatprep.subr.bf16.mxu0 %v1103_v44  ;;  %v227_v21 = vld [vmem:[%s1485_s5] sm:$0x3] }
  0x5e   :  { %1138 = vmatpush1.bf16.msra.mxu1 %v1137_v49  ;;  %v232_v22 = vrot.slane %v227_v21, %v231_v20  ;;  %v968_v24 = vld [vmem:[%s1484_s4] ss:$0 sm:$0xff]  ;;  %v236_v36 = vrot.slane %v227_v21, %v235_v30  ;;  %s1306_s4 = smov [#allocation10]  }
  0x5f   :  { %1140 = vmatprep.subr.bf16.mxu1 %v1139_v51  ;;  %s954_s5 = sshll.u32 %s1306_s4, 4  ;;  %s955_s5 = int_to_ptr.vmem [resolvable:$true] %s954_s5 }
  0x60   :  { %1106 = vmatpush3.bf16.msra.mxu0 %v1103_v44  ;;  %s1266_s27 = scalar_lea.vmem %s955_s5, 512  ;;  %p1271_p5 = scmp.lt.s32.totalorder %s955_s5, %s955_s5 }
  0x61   :  { %1108 = vmatprep.subr.bf16.mxu0 %v1107_v54  ;;  %p1267_p4 = scmp.ne.s32.totalorder %s955_s5, %s1266_s27  ;;  %p1272_p6 = scmp.lt.s32.totalorder %s1266_s27, %s1266_s27 }
  0x62   :  { %1142 = vmatpush1.bf16.msra.mxu1 %v1141_v59 }
  0x63   :  { %1144 = vmatprep.subr.bf16.mxu1 %v1143_v60  ;;  %p1273_p7 = por %p1272_p6, %p1271_p5 }
  0x64   :  { %1110 = vmatpush3.bf16.msra.mxu0 %v1107_v54 }
  0x65   :  { %1112 = vmatprep.subr.bf16.mxu0 %v1111_v63  ;;  %p1274_p8 = pnand %p1273_p7, %p1267_p4 }
  0x66   :  { %1146 = vmatpush1.bf16.msra.mxu1 %v1145_v5 }
  0x67   :  { %1148 = vmatprep.subr.bf16.mxu1 %v1147_v6 }
  0x68   :  { %1114 = vmatpush3.bf16.msra.mxu0 %v1111_v63 }
  0x69   :  { %1116 = vmatprep.subr.bf16.mxu0 %v1115_v9 }
  0x6a   :  { %1150 = vmatpush1.bf16.msra.mxu1 %v1149_v10 }
  0x6b   :  { %1062 = vmatprep.subr.mxu1 %v1304_v0 }
  0x6c   :  { %1118 = vmatpush3.bf16.msra.mxu0 %v1115_v9 }
  0x6d   :  { %1047 = vmatprep.subr.mxu0 %v1304_v0  ;;  %304 = vmatmul.mubr.f32.vlgmr.msra.gmra.mrb[0].mxu1 %v83_v11 }
  0x6e   :  { %309 = vmatprep.mubr.f32.mxu1 %v1304_v0 }
  0x6f   :  { %1042 = vmatmul.mubr.f32.vlgmr.msra.gmra.mrb[0].mxu0 %v80_v12 }
  0x70   :  { %1044 = vmatprep.mubr.f32.mxu0 %v81_v13 }
  0x71   :  { %310 = vmatmul.mubr.f32.gmra.mrb[2].mxu1 %v84_v14 }
  0x72   :  { %315 = vmatprep.mubr.f32.mxu1 %v1304_v0 }
  0x73   :  { %1045 = vmatmul.mubr.f32.gmra.mrb[2].mxu0 %v82_v15 }
  0x74   :  { %1049 = vmatprep.mubr.msk.f32.mxu0 %vm1305_vm0, %v1304_v0 }
  0x75   :  { %316 = vmatmul.mubr.f32.gmra.mrb[4].mxu1 %v85_v16 }
  0x76   :  { %321 = vmatprep.mubr.f32.mxu1 %v1304_v0 }
  0x79   :  { %322 = vmatmul.mubr.f32.gmra.mrb[6].mxu1 %v86_v17 }
  0x7a   :  { %1064 = vmatprep.mubr.msk.f32.mxu1 %vm1305_vm0, %v1304_v0 }
 0x140   :  { %v305_v23 = vpop.f32.mrb[0].mxu1 }
 0x141   :  { %v306_v25 = vadd.f32 %v305_v23, %v232_v22  ;;  %v307_v26 = vpop.f32.mrb[1].mxu1 }
 0x142   :  { %v1043_v27 = vpop.f32.mrb[0].mxu0  ;;  %v308_v44 = vadd.f32 %v307_v26, %v236_v36 }
 0x143   :  { %v176_v28 = vpop.f32.mrb[1].mxu0  ;;  %1048 = vmatpush3.xpose.msra.mxu0 %v306_v25  ;;  %v182_v37 = vadd.f32 %v1043_v27, %v968_v24 }
 0x144   :  { %v177_v29 = vadd.f32 %v968_v24, %v176_v28  ;;  %v311_v31 = vpop.f32.mrb[2].mxu1  ;;  %1052 = vmatprep.subr.mxu0 %v1304_v0 }
 0x145   :  { %v312_v32 = vadd.f32 %v311_v31, %v232_v22  ;;  %v313_v33 = vpop.f32.mrb[3].mxu1 }
 0x146   :  { %v1046_v34 = vpop.f32.mrb[2].mxu0  ;;  %1050 = vmatmul.mubr.f32.vlgmr.msra.gmra.mrb[4].mxu0 %v177_v29  ;;  %v314_v49 = vadd.f32 %v313_v33, %v236_v36 }
 0x147   :  { %v186_v35 = vpop.f32.mrb[3].mxu0  ;;  %1053 = vmatpush3.xpose.msra.mxu0 %v312_v32  ;;  %1054 = vmatprep.mubr.msk.f32.mxu0 %vm1305_vm0, %v1304_v0  ;;  %v192_v48 = vadd.f32 %v1046_v34, %v968_v24 }
 0x148   :  { %v317_v38 = vpop.f32.mrb[4].mxu1  ;;  %1057 = vmatprep.subr.mxu0 %v1304_v0  ;;  %v187_v42 = vadd.f32 %v968_v24, %v186_v35 }
 0x149   :  { %v318_v39 = vadd.f32 %v317_v38, %v232_v22  ;;  %v319_v40 = vpop.f32.mrb[5].mxu1 }
 0x14a   :  { %v1433_v41 = vadd.f32 %v319_v40, %v236_v36  ;;  %1055 = vmatmul.mubr.f32.vlgmr.msra.gmra.mrb[6].mxu0 %v182_v37 }
 0x14b   :  { %1058 = vmatpush3.xpose.msra.mxu0 %v318_v39  ;;  %1059 = vmatprep.mubr.msk.f32.mxu0 %vm1305_vm0, %v1304_v0 }
 0x14c   :  { %v323_v43 = vpop.f32.mrb[6].mxu1  ;;  %1067 = vmatprep.subr.mxu0 %v1304_v0 }
 0x14d   :  { %v324_v45 = vadd.f32 %v323_v43, %v232_v22  ;;  %v325_v46 = vpop.f32.mrb[7].mxu1 }
 0x14e   :  { %v1438_v47 = vadd.f32 %v325_v46, %v236_v36  ;;  %1060 = vmatmul.mubr.f32.vlgmr.msra.gmra.mrb[8].mxu0 %v187_v42 }
 0x14f   :  { %1063 = vmatpush3.xpose.msra.mxu1 %v324_v45  ;;  %1068 = vmatpush3.msra.mxu0 %v308_v44 }
 0x150   :  { %1072 = vmatprep.subr.mxu1 %v1304_v0  ;;  %1069 = vmatprep.mubr.msk.f32.mxu0 %vm1305_vm0, %v1304_v0 }
 0x151   :  { %1077 = vmatprep.subr.mxu0 %v1304_v0 }
 0x152   :  { %1065 = vmatmul.mubr.f32.vlgmr.msra.gmra.mrb[8].mxu1 %v192_v48 }
 0x153   :  { %1073 = vmatpush3.msra.mxu1 %v314_v49  ;;  %1074 = vmatprep.mubr.msk.f32.mxu1 %vm1305_vm0, %v1304_v0 }
 0x154   :  { %1082 = vmatprep.subr.mxu1 %v1304_v0 }
 0x219   :  { %v394_v50 = vpop.f32.mrb[4].mxu0 }
 0x21a   :  { %v609_v51 = vsel %vm608_vm1, %v394_v50, -inf  ;;  %v1051_v52 = vpop.f32.mrb[5].mxu0 }
 0x21b   :  { %610 = vmax.xlane.f32.xlu0 %v609_v51 }
 0x21d   :  { %v464_v53 = vpop.f32.mrb[6].mxu0 }
 0x21e   :  { %v612_v54 = vsel %vm608_vm1, %v464_v53, -inf  ;;  %v1056_v55 = vpop.f32.mrb[7].mxu0 }
 0x21f   :  { %613 = vmax.xlane.f32.xlu0 %v612_v54 }
 0x221   :  { %v534_v56 = vpop.f32.mrb[8].mxu0 }
 0x222   :  { %v615_v57 = vsel %vm608_vm1, %v534_v56, -inf  ;;  %v1061_v58 = vpop.f32.mrb[9].mxu0 }
 0x223   :  { %616 = vmax.xlane.f32.xlu1 %v615_v57 }
 0x225   :  { %v604_v59 = vpop.f32.mrb[8].mxu1 }
 0x226   :  { %v618_v60 = vsel %vm608_vm1, %v604_v59, -inf  ;;  %v1066_v61 = vpop.f32.mrb[9].mxu1 }
 0x227   :  { %619 = vmax.xlane.f32.xlu1 %v618_v60 }
 0x2a8   :  { %v611_v62 = vpop.xlane.xlu0 %610 }
 0x2a9   :  { %v621_v63 = vsub.f32 %v394_v50, %v611_v62 }
 0x2ab   :  { %v625_v1 = vmul.f32 1.442695, %v621_v63 }
 0x2ac   :  { %v614_v2 = vpop.xlane.xlu0 %613 }
 0x2ad   :  { %1162 = vpow2.f32 %v625_v1  ;;  %v622_v3 = vsub.f32 %v464_v53, %v614_v2 }
 0x2af   :  { %v627_v4 = vmul.f32 1.442695, %v622_v3 }
 0x2b0   :  { %v617_v5 = vpop.xlane.xlu1 %616 }
 0x2b1   :  { %1164 = vpow2.f32 %v627_v4  ;;  %v623_v6 = vsub.f32 %v534_v56, %v617_v5 }
 0x2b3   :  { %v629_v7 = vmul.f32 1.442695, %v623_v6 }
 0x2b4   :  { %v620_v8 = vpop.xlane.xlu1 %619 }
 0x2b5   :  { %1166 = vpow2.f32 %v629_v7  ;;  %v624_v9 = vsub.f32 %v604_v59, %v620_v8 }
 0x2b7   :  { %v1163_v10 = vpop.eup %1162  ;;  %v631_v11 = vmul.f32 1.442695, %v624_v9 }
 0x2b8   :  { %v633_v12 = vsel %vm608_vm1, %v1163_v10, 0.0 }
 0x2b9   :  { %1168 = vpow2.f32 %v631_v11  ;;  %634 = vadd.xlane.f32.xlu0 %v633_v12 }
 0x2bb   :  { %v1165_v13 = vpop.eup %1164 }
 0x2bc   :  { %v636_v14 = vsel %vm608_vm1, %v1165_v13, 0.0 }
 0x2bd   :  { %637 = vadd.xlane.f32.xlu1 %v636_v14 }
 0x2bf   :  { %v1167_v15 = vpop.eup %1166 }
 0x2c0   :  { %v639_v16 = vsel %vm608_vm1, %v1167_v15, 0.0 }
 0x2c1   :  { %640 = vadd.xlane.f32.xlu0 %v639_v16 }
 0x2c3   :  { %v1169_v17 = vpop.eup %1168 }
 0x2c4   :  { %v642_v18 = vsel %vm608_vm1, %v1169_v17, 0.0 }
 0x2c5   :  { %643 = vadd.xlane.f32.xlu1 %v642_v18 }
 0x346   :  { %v635_v19 = vpop.xlane.xlu0 %634 }
 0x347   :  { %1170 = vrcp.f32 %v635_v19 }
 0x34a   :  { %v638_v20 = vpop.xlane.xlu1 %637 }
 0x34b   :  { %1172 = vrcp.f32 %v638_v20 }
 0x34e   :  { %v641_v21 = vpop.xlane.xlu0 %640 }
 0x34f   :  { %1174 = vrcp.f32 %v641_v21 }
 0x351   :  { %v1171_v22 = vpop.eup %1170 }
 0x352   :  { %v649_v23 = vmul.f32 %v1171_v22, %v1163_v10  ;;  %v644_v24 = vpop.xlane.xlu1 %643 }
 0x353   :  { %1176 = vrcp.f32 %v644_v24 }
 0x354   :  { %1070 = vmatmul.mubr.msk.f32.vlgmr.msra.gmra.mrb[10].mxu0 %vm608_vm1, %v649_v23 }
 0x355   :  { %v1173_v25 = vpop.eup %1172  ;;  %1078 = vmatpush3.msra.mxu0 %v1433_v41  ;;  %1079 = vmatprep.mubr.msk.f32.mxu0 %vm1305_vm0, %v1304_v0 }
 0x356   :  { %v650_v26 = vmul.f32 %v1173_v25, %v1165_v13 }
 0x358   :  { %1075 = vmatmul.mubr.msk.f32.vlgmr.msra.gmra.mrb[10].mxu1 %vm608_vm1, %v650_v26 }
 0x359   :  { %v1175_v27 = vpop.eup %1174  ;;  %1083 = vmatpush3.msra.mxu1 %v1438_v47  ;;  %1084 = vmatprep.mubr.msk.f32.mxu1 %vm1305_vm0, %v1304_v0 }
 0x35a   :  { %v651_v28 = vmul.f32 %v1175_v27, %v1167_v15 }
 0x35c   :  { %1080 = vmatmul.mubr.msk.f32.vlgmr.msra.gmra.mrb[12].mxu0 %vm608_vm1, %v651_v28 }
 0x35d   :  { %v1177_v29 = vpop.eup %1176 }
 0x35e   :  { %v652_v30 = vmul.f32 %v1177_v29, %v1169_v17 }
 0x360   :  { %1085 = vmatmul.mubr.msk.f32.vlgmr.msra.gmra.mrb[12].mxu1 %vm608_vm1, %v652_v30 }
 0x427   :  { %v722_v31 = vpop.f32.mrb[10].mxu0 }
 0x428   :  { %945 = vst [vmem:[#allocation10] sm:$0xff] %v722_v31  ;;  %v1071_v32 = vpop.f32.mrb[11].mxu0 }
 0x42b   :  { %v795_v33 = vpop.f32.mrb[10].mxu1 }
 0x42c   :  { %946 = vst [vmem:[#allocation10 + $0x8] sm:$0xff] %v795_v33  ;;  %v1076_v34 = vpop.f32.mrb[11].mxu1 }
 0x42f   :  { %v868_v35 = vpop.f32.mrb[12].mxu0 }
 0x430   :  { %947 = vst [vmem:[#allocation10 + $0x10] sm:$0xff] %v868_v35  ;;  %v1081_v36 = vpop.f32.mrb[13].mxu0 }
 0x433   :  { %v941_v0 = vpop.f32.mrb[12].mxu1 }
 0x434   :  { %948 = vst [vmem:[#allocation10 + $0x18] sm:$0xff] %v941_v0  ;;  %v1086_v37 = vpop.f32.mrb[13].mxu1 }
 0x435   :  { %1277 = shalt.err (!%p1274_p8)
}
 0x436   :  { %s1278_s30 = scalar_lea.hbm %s1486_s6, 512 }
 0x437   :  { %p1279_p9 = scmp.ne.s32.totalorder %s1486_s6, %s1278_s30  ;;  %p1282_p10 = scmp.lt.u32.totalorder %s1278_s30, %s1486_s6 }
 0x439   :  { %p1284_p11 = pnand %p1282_p10, %p1279_p9 }
 0x43b   :  { %1287 = shalt.err (!%p1284_p11)
}
 0x43c   :  { %960 = dma.vmem_to_hbm [thread:$0]  %s955_s5, 512, %s1486_s6, [#allocation4], %s1298_s9, %s1298_s9, %s1299_s10  }
 0x43d   :  { %1294 = dma.done.wait [#allocation4], 512  }
 0x43e   :  { %1295 = vsyncadd [#allocation4], 4294966784 }
 0x43f   :  { %964 = vsyncpa [#allocation3], 1 }
 0x440   :  { %965 = vsyncpa [#allocation6], 1 }
 0x441   :  { %966 = vsyncpa [#allocation9], 1 }
 0x442   :  { %967 = vsyncpa [#allocation4], 1 }

</bundles_post_ra>
